<compile_context>
chip_gen: v6e
topology: v6e:2x2x1
jax: 0.10.0
libtpu: 0.0.40
codegen_flags: <defaults>
</compile_context>

<pallas_src>
import math

import jax
import jax.numpy as jnp
from jax.experimental import pallas as pl
from jax.experimental.pallas import tpu as pltpu

LANE = 128            # vreg lane width
_MIB = 1024 * 1024


def _ftxscale_kernel(x_ref, p_ref, o_ref):
    # x_ref: (tile_rows, tile_f) VMEM block.
    # p_ref: (1, tile_f) VMEM block; its row-block index is constant across the
    #        row grid axis, so Pallas does not re-fetch it every row step.
    o_ref[...] = (x_ref[...] * p_ref[...]).astype(o_ref.dtype)


def _vmem_budgets():
    """(vmem_limit_bytes, per-x-block byte target) sized per TPU generation."""
    try:
        cap = int(pltpu.get_tpu_info().vmem_capacity_bytes)
    except Exception:
        cap = 64 * _MIB  # conservative fallback = smallest generation (v7x)
    # Headroom for 2x input + 2x output buffers + pars tile + compiler scratch.
    vmem_limit = min(cap * 3 // 4, 64 * _MIB)       # v7x -> 48 MiB, v5e/v6e -> 64 MiB
    block_target = max(2 * _MIB, min(10 * _MIB, vmem_limit // 6))
    return vmem_limit, block_target


def ftx_scale(x: jax.Array, pars: jax.Array, *, donate_x: bool = False) -> jax.Array:
    """out[..., f] = x[..., f] * pars[f]   (== x @ jnp.diag(pars))."""
    orig_shape = x.shape
    n_features = orig_shape[-1]
    assert pars.shape == (n_features,)

    # Precision contract: compute & store in x.dtype.
    pars = pars.astype(x.dtype)

    x2d = x.reshape(-1, n_features)
    n_rows = x2d.shape[0]
    dtype_bytes = x2d.dtype.itemsize
    SUBLANE = max(8, 32 // dtype_bytes)             # 8 f32 / 16 bf16 / 32 int8

    # ---- Lane-dense layout ---------------------------------------------------
    # If F is not a multiple of 128 lanes, fold k = 128/gcd(F,128) consecutive
    # rows into one so the last dim becomes lcm(F,128); pars simply repeats k
    # times (identical semantics).  This avoids masked vst.msk partial stores /
    # padded VMEM rows -- the biggest single measured lever for narrow F.
    # If n_rows % k != 0 we pad < k zero rows and slice them off afterwards
    # instead of reverting to the masked-store layout.
    fold, padded_rows = 1, n_rows
    if n_features % LANE != 0:
        fold = LANE // math.gcd(n_features, LANE)
        rem = n_rows % fold
        if rem:
            pad = fold - rem
            x2d = jnp.concatenate(
                [x2d, jnp.zeros((pad, n_features), x2d.dtype)], axis=0)
            padded_rows = n_rows + pad
    rows_eff = padded_rows // fold
    f_eff = n_features * fold                        # always a multiple of 128 here
    if fold > 1:
        x2d = x2d.reshape(rows_eff, f_eff)
        pars_eff = jnp.tile(pars, fold)
    else:
        pars_eff = pars
    p2d = pars_eff.reshape(1, f_eff)

    # ---- Block sizing: per-block byte target, per TPU generation ---------------
    vmem_limit_bytes, block_target_bytes = _vmem_budgets()

    # Feature-axis tile: full f_eff when it fits (keeps each DMA row contiguous),
    # otherwise the largest multiple of 128 keeping an >= SUBLANE-row block under
    # the byte target (prefer a divisor of f_eff so all blocks stay full).
    max_tile_f = max(LANE,
                     (block_target_bytes // (SUBLANE * dtype_bytes)) // LANE * LANE)
    if f_eff <= max_tile_f:
        tile_f = f_eff
    else:
        tile_f = max_tile_f
        cand = max_tile_f
        for _ in range(64):                          # bounded divisor search
            if f_eff % cand == 0:
                tile_f = cand
                break
            cand -= LANE
            if cand < LANE:
                break

    # Row tile: as many rows as fit the byte target (multiple of SUBLANE),
    # capped at the full row extent.
    tile_rows = block_target_bytes // (tile_f * dtype_bytes)
    tile_rows = max(SUBLANE, (tile_rows // SUBLANE) * SUBLANE)
    if tile_rows >= rows_eff:
        tile_rows = rows_eff

    # v7x has 2 TensorCores: ensure non-trivial inputs yield a few grid steps so
    # the "parallel" axes actually shard and software pipelining stays alive.
    n_row_blocks = pl.cdiv(rows_eff, tile_rows)
    n_feat_blocks = pl.cdiv(f_eff, tile_f)
    MIN_GRID_STEPS = 4
    if n_row_blocks * n_feat_blocks < MIN_GRID_STEPS and rows_eff > SUBLANE:
        want_rb = min(MIN_GRID_STEPS, pl.cdiv(rows_eff, SUBLANE))
        tile_rows = pl.cdiv(pl.cdiv(rows_eff, want_rb), SUBLANE) * SUBLANE
        if tile_rows >= rows_eff:
            tile_rows = rows_eff
        n_row_blocks = pl.cdiv(rows_eff, tile_rows)

    grid = (n_row_blocks, n_feat_blocks)
    bytes_accessed = 2 * rows_eff * f_eff * dtype_bytes + f_eff * dtype_bytes

    out2d = pl.pallas_call(
        _ftxscale_kernel,
        out_shape=jax.ShapeDtypeStruct((rows_eff, f_eff), x.dtype),
        grid_spec=pltpu.PrefetchScalarGridSpec(
            num_scalar_prefetch=0,
            grid=grid,
            in_specs=[
                pl.BlockSpec((tile_rows, tile_f), lambda i, j: (i, j)),
                pl.BlockSpec((1, tile_f), lambda i, j: (0, j)),
            ],
            out_specs=pl.BlockSpec((tile_rows, tile_f), lambda i, j: (i, j)),
        ),
        compiler_params=pltpu.CompilerParams(
            dimension_semantics=("parallel", "parallel"),
            vmem_limit_bytes=vmem_limit_bytes,
        ),
        cost_estimate=pl.CostEstimate(
            flops=rows_eff * f_eff,
            transcendentals=0,
            bytes_accessed=bytes_accessed,
        ),
        input_output_aliases=({0: 0} if donate_x else {}),
    )(x2d, p2d)

    if fold > 1:
        out2d = out2d.reshape(padded_rows, n_features)
        if padded_rows != n_rows:
            out2d = out2d[:n_rows]
    return out2d.reshape(orig_shape)


if __name__ == "__main__":
    key = jax.random.PRNGKey(0)
    n_features = 32
    batch, seq = 2, 8  # x: [batch, seq, n_features]

    kx, _ = jax.random.split(key)
    x = jax.random.normal(kx, (batch, seq, n_features), dtype=jnp.float32)

    # nn.Parameter(torch.ones(n_features)) -> ones init; perturb deterministically
    # so the test is non-trivial.
    pars = jnp.ones((n_features,), dtype=jnp.float32)
    pars = pars + 0.01 * jnp.arange(n_features, dtype=jnp.float32)

    out = ftx_scale(x, pars)
    jax.block_until_ready(out)
    ref = x @ jnp.diag(pars)
    assert out.shape == x.shape
    assert jnp.allclose(out, ref, atol=1e-6, rtol=1e-6)

    # Exercise the ragged path (rows not divisible by the lane-dense fold).
    x2 = jax.random.normal(kx, (batch, 9, n_features), dtype=jnp.float32)
    out2 = ftx_scale(x2, pars)
    jax.block_until_ready(out2)
    ref2 = x2 @ jnp.diag(pars)
    assert out2.shape == x2.shape
    assert jnp.allclose(out2, ref2, atol=1e-6, rtol=1e-6)

    print("KERNEL_OK")
</pallas_src>

<mosaic_0001>
module attributes {stable_mosaic.version = 11 : i64} {
  func.func @_ftxscale_kernel(%arg0: i32, %arg1: i32, %arg2: memref<4x128xf32, #tpu.memory_space<vmem>>, %arg3: memref<1x128xf32, #tpu.memory_space<vmem>>, %arg4: memref<4x128xf32, #tpu.memory_space<vmem>>) attributes {dimension_semantics = [#tpu.dimension_semantics<parallel>, #tpu.dimension_semantics<parallel>], iteration_bounds = array<i64: 1, 1>, scalar_prefetch = 0 : i64, scratch_operands = 0 : i64, tpu.core_type = #tpu.core_type<tc>, window_params = [{transform_indices = @transform_0, window_bounds = array<i64: 4, 128>}, {transform_indices = @transform_1, window_bounds = array<i64: 1, 128>}, {transform_indices = @transform_2, window_bounds = array<i64: 4, 128>}]} {
    %c0 = arith.constant 0 : index
    %c0_0 = arith.constant 0 : index
    %0 = vector.load %arg2[%c0, %c0_0] : memref<4x128xf32, #tpu.memory_space<vmem>>, vector<4x128xf32>
    %c0_1 = arith.constant 0 : index
    %c0_2 = arith.constant 0 : index
    %1 = vector.load %arg3[%c0_1, %c0_2] : memref<1x128xf32, #tpu.memory_space<vmem>>, vector<1x128xf32>
    %2 = vector.broadcast %1 : vector<1x128xf32> to vector<4x128xf32>
    %3 = arith.mulf %0, %2 : vector<4x128xf32>
    %c0_3 = arith.constant 0 : index
    %c0_4 = arith.constant 0 : index
    %4 = vector.load %arg4[%c0_3, %c0_4] : memref<4x128xf32, #tpu.memory_space<vmem>>, vector<4x128xf32>
    tpu.vector_store %arg4[%c0_3, %c0_4], %3 {strides = array<i32>} : memref<4x128xf32, #tpu.memory_space<vmem>>, vector<4x128xf32>,
    return
  }
  func.func @transform_0(%arg0: i32, %arg1: i32) -> (i32, i32) {
    %c0_i32 = arith.constant 0 : i32
    return %arg0, %arg1 : i32, i32
  }
  func.func @transform_1(%arg0: i32, %arg1: i32) -> (i32, i32) {
    %c0_i32 = arith.constant 0 : i32
    %c0_i32_0 = arith.constant 0 : i32
    return %c0_i32, %arg1 : i32, i32
  }
  func.func @transform_2(%arg0: i32, %arg1: i32) -> (i32, i32) {
    %c0_i32 = arith.constant 0 : i32
    return %arg0, %arg1 : i32, i32
  }
}

</mosaic_0001>

<bundles_post_ra>
// kernel: tpu_custom_call.1
= control target key start
LH: loop header
LB: loop body
LE: loop exit
PB: predicated region body
PF: predicated region fallthrough
CT: control target
= control target key end

     0   :  { %7 = vsyncpa [#allocation3], 0  ;;  %s122_s0 = inlined_call_operand.hbm [shape: f32[4,128], index: 0, kind: input, shape index: {}]   ;;  %s123_s1 = inlined_call_operand.vmem [shape: f32[1,128], index: 1, kind: input, shape index: {}]   ;;  %s124_s2 = inlined_call_operand.hbm [shape: f32[4,128], index: 2, kind: output, shape index: {}]  }
   0x1   :  { %8 = vsyncpa [#allocation4], 0  ;;  %s96_s9 = smov [#allocation2]  }
   0x2   :  { %s15_s10 = sshll.u32 %s96_s9, 4  ;;  %s16_s10 = int_to_ptr.vmem [resolvable:$true] %s15_s10 }
   0x3   :  { %s60_s11 = scalar_lea.vmem %s16_s10, 64  ;;  %p65_p1 = scmp.lt.s32.totalorder %s16_s10, %s16_s10 }
   0x4   :  { %p61_p0 = scmp.ne.s32.totalorder %s16_s10, %s60_s11  ;;  %p66_p2 = scmp.lt.s32.totalorder %s60_s11, %s60_s11 }
   0x6   :  { %p67_p3 = por %p66_p2, %p65_p1 }
   0x8   :  { %p68_p4 = pnand %p67_p3, %p61_p0 }
   0xa   :  { %71 = shalt.err (!%p68_p4)
}
   0xb   :  { %18 = dma.hbm_to_vmem [thread:$0]  %s122_s0, 64, %s16_s10, [#allocation3]  }
   0xc   :  { %92 = dma.done.wait [#allocation3], 64  }
   0xd   :  { %93 = vsyncadd [#allocation3], 4294967232  ;;  %s97_s14 = smov [#allocation5]   ;;  %v24_v0 = vld [vmem:[#allocation2] sm:$0xf] }
   0xe   :  { %s40_s15 = sshll.u32 %s97_s14, 4  ;;  %v49_v1 = vld [vmem:[%s123_s1] ss:$0 sm:$0xff]  ;;  %s41_s15 = int_to_ptr.vmem [resolvable:$true] %s40_s15 }
   0xf   :  { %v32_v2 = vmul.f32 %v49_v1, %v24_v0  ;;  %s72_s18 = scalar_lea.vmem %s41_s15, 64  ;;  %p77_p6 = scmp.lt.s32.totalorder %s41_s15, %s41_s15 }
  0x10   :  { %p73_p5 = scmp.ne.s32.totalorder %s41_s15, %s72_s18  ;;  %p78_p7 = scmp.lt.s32.totalorder %s72_s18, %s72_s18 }
  0x11   :  { %33 = vst [vmem:[#allocation5] sm:$0xf] %v32_v2 }
  0x12   :  { %p79_p8 = por %p78_p7, %p77_p6 }
  0x14   :  { %p80_p9 = pnand %p79_p8, %p73_p5 }
  0x16   :  { %83 = shalt.err (!%p80_p9)
}
  0x17   :  { %43 = dma.vmem_to_hbm [thread:$0]  %s41_s15, 64, %s124_s2, [#allocation4]  }
  0x18   :  { %94 = dma.done.wait [#allocation4], 64  }
  0x19   :  { %95 = vsyncadd [#allocation4], 4294967232 }
  0x1a   :  { %47 = vsyncpa [#allocation3], 1 }
  0x1b   :  { %48 = vsyncpa [#allocation4], 1 }

</bundles_post_ra>
